<compile_context>
chip_gen: v6e
topology: v6e:2x2x1
jax: 0.10.0
libtpu: 0.0.40
codegen_flags: <defaults>
</compile_context>

<pallas_src>
import functools

import jax
import jax.numpy as jnp
from jax.experimental import pallas as pl
from jax.experimental.pallas import tpu as pltpu

_LANE = 128
_SUBLANE = 8


def _round_up(n, m):
    return (n + m - 1) // m * m


def _pad2d(a, rows, cols):
    r, c = a.shape
    return jnp.pad(a, ((0, rows - r), (0, cols - c)))


# ----------------------------------------------------------------------------
# Kernel 1: fused MLP forward (fcHidden -> ReLU -> fcOut), lane-dense output
# ----------------------------------------------------------------------------
def _mlp_fwd_kernel(x_ref, w1_ref, b1_ref, w2_ref, b2_ref, out_ref, *,
                    compute_dtype):
    x = x_ref[...].astype(compute_dtype)
    w1 = w1_ref[...].astype(compute_dtype)
    h = jnp.dot(x, w1, preferred_element_type=jnp.float32)
    h = jnp.maximum(h + b1_ref[...].astype(jnp.float32), 0.0)
    w2 = w2_ref[...].astype(compute_dtype)
    logits = jnp.dot(h.astype(compute_dtype), w2,
                     preferred_element_type=jnp.float32)
    logits = logits + b2_ref[...].astype(jnp.float32)
    out_ref[...] = logits.astype(out_ref.dtype)


# ----------------------------------------------------------------------------
# Kernel 2: fused MLP forward + mean CrossEntropy loss (single pallas_call).
# Logits stay in vregs/VMEM for the loss math; only the lane-dense logits block
# and a (1,1) accumulated loss are emitted.
# ----------------------------------------------------------------------------
def _mlp_fwd_loss_kernel(x_ref, w1_ref, b1_ref, w2_ref, b2_ref,
                         y_ref, yw_ref, out_ref, loss_ref, *,
                         dimC, compute_dtype):
    # ---- fused 2-layer MLP ----
    x = x_ref[...].astype(compute_dtype)
    w1 = w1_ref[...].astype(compute_dtype)
    h = jnp.dot(x, w1, preferred_element_type=jnp.float32)
    h = jnp.maximum(h + b1_ref[...].astype(jnp.float32), 0.0)
    w2 = w2_ref[...].astype(compute_dtype)
    logits = jnp.dot(h.astype(compute_dtype), w2,
                     preferred_element_type=jnp.float32)
    logits = logits + b2_ref[...].astype(jnp.float32)
    out_ref[...] = logits.astype(out_ref.dtype)   # lane-dense (TB, 128) store

    # ---- cross-entropy on the VMEM-resident logits ----
    TB, C_pad = logits.shape
    lane = jax.lax.broadcasted_iota(jnp.int32, (TB, C_pad), 1)
    # padded class lanes (>= dimC) must not participate in the softmax
    masked = jnp.where(lane < dimC, logits, jnp.float32(-1e30))
    m = jnp.max(masked, axis=-1, keepdims=True)                 # (TB, 1)
    z = masked - m
    lse = jnp.log(jnp.sum(jnp.exp(z), axis=-1, keepdims=True))  # (TB, 1)
    onehot = (lane == y_ref[...]).astype(jnp.float32)           # y: (TB, 1) int32
    picked = jnp.sum(z * onehot, axis=-1, keepdims=True)        # (TB, 1)
    per_example = lse - picked                                  # (TB, 1)
    # yw carries 1/B for valid rows and 0 for batch-padding rows -> exact mean.
    tile_loss = jnp.sum(per_example * yw_ref[...])

    @pl.when(pl.program_id(0) == 0)
    def _():
        loss_ref[0, 0] = 0.0
    loss_ref[0, 0] = loss_ref[0, 0] + tile_loss


# ----------------------------------------------------------------------------
# Wrapper mirroring DISCRIMINATOR.forward(x, y, compute_loss)
# ----------------------------------------------------------------------------
def discriminator_apply(params, x, y, compute_loss=False, *,
                        compute_dtype=jnp.float32, batch_tile=128):
    """x: (B, dimX), y: (B,) int labels. Returns logits or (logits, loss)."""
    w1, b1, w2, b2 = params["w1"], params["b1"], params["w2"], params["b2"]
    B, dimX = x.shape
    dimH = w1.shape[1]
    dimC = w2.shape[1]

    # Lane-dense class dim and sublane-aligned batch tiling.
    C_pad = _round_up(dimC, _LANE)
    B_pad = _round_up(B, _SUBLANE)
    TB = batch_tile if B_pad > batch_tile else B_pad
    B_pad = _round_up(B_pad, TB)
    nB = B_pad // TB

    x_p = _pad2d(x.astype(jnp.float32), B_pad, dimX)
    w2_p = _pad2d(w2, dimH, C_pad)          # zero-padded lanes -> 0 logits there
    b2_p = _pad2d(b2, 1, C_pad)

    # NOTE: for very large dimX/dimH (v7x's 64 MiB VMEM/TC) the whole-weight
    # residency below should be replaced by K-tiling with a f32 accumulator
    # scratch; at these sizes the full weights fit comfortably.
    in_specs = [
        pl.BlockSpec((TB, dimX), lambda i: (i, 0)),      # x: batch-tiled
        pl.BlockSpec((dimX, dimH), lambda i: (0, 0)),    # w1: VMEM-resident
        pl.BlockSpec((1, dimH), lambda i: (0, 0)),       # b1
        pl.BlockSpec((dimH, C_pad), lambda i: (0, 0)),   # w2 (lane-padded)
        pl.BlockSpec((1, C_pad), lambda i: (0, 0)),      # b2
    ]

    flops = 2 * B_pad * dimX * dimH + 2 * B_pad * dimH * C_pad
    bytes_io = 4 * (x_p.size + w1.size + b1.size + w2_p.size + b2_p.size
                    + B_pad * C_pad)

    if not compute_loss:
        out = pl.pallas_call(
            functools.partial(_mlp_fwd_kernel, compute_dtype=compute_dtype),
            out_shape=jax.ShapeDtypeStruct((B_pad, C_pad), jnp.float32),
            grid=(nB,),
            in_specs=in_specs,
            out_specs=pl.BlockSpec((TB, C_pad), lambda i: (i, 0)),
            compiler_params=pltpu.CompilerParams(
                dimension_semantics=("parallel",),
                vmem_limit_bytes=64 << 20),
            cost_estimate=pl.CostEstimate(flops=flops, transcendentals=0,
                                          bytes_accessed=bytes_io),
        )(x_p, w1, b1, w2_p, b2_p)
        return out[:B, :dimC]

    # compute_loss=True: fused forward + CE loss, one kernel launch.
    # TODO(synk): no ignore_index / invalid-label handling (PyTorch default
    # ignore_index=-100); labels are assumed to be valid class indices.
    y2d = jnp.pad(y.astype(jnp.int32).reshape(B, 1),
                  ((0, B_pad - B), (0, 0)), constant_values=-1)
    yw = jnp.pad(jnp.full((B, 1), 1.0 / B, jnp.float32),
                 ((0, B_pad - B), (0, 0)))

    out, loss = pl.pallas_call(
        functools.partial(_mlp_fwd_loss_kernel, dimC=dimC,
                          compute_dtype=compute_dtype),
        out_shape=(jax.ShapeDtypeStruct((B_pad, C_pad), jnp.float32),
                   jax.ShapeDtypeStruct((1, 1), jnp.float32)),
        grid=(nB,),
        in_specs=in_specs + [
            pl.BlockSpec((TB, 1), lambda i: (i, 0)),     # labels
            pl.BlockSpec((TB, 1), lambda i: (i, 0)),     # per-row loss weights
        ],
        out_specs=(
            pl.BlockSpec((TB, C_pad), lambda i: (i, 0)),
            pl.BlockSpec((1, 1), lambda i: (0, 0)),      # resident loss accumulator
        ),
        compiler_params=pltpu.CompilerParams(
            dimension_semantics=("arbitrary",),          # loss accumulates across tiles
            vmem_limit_bytes=64 << 20),
        cost_estimate=pl.CostEstimate(flops=flops,
                                      transcendentals=B_pad * C_pad,
                                      bytes_accessed=bytes_io),
    )(x_p, w1, b1, w2_p, b2_p, y2d, yw)
    return out[:B, :dimC], loss[0, 0]


def init_params(key, dimX, dimH, dimC):
    """Deterministic init mimicking nn.Linear's uniform(-1/sqrt(fan_in), 1/sqrt(fan_in))."""
    k1, k2, k3, k4 = jax.random.split(key, 4)
    s1 = 1.0 / jnp.sqrt(dimX)
    s2 = 1.0 / jnp.sqrt(dimH)
    return {
        # stored as (in, out) = transpose of PyTorch's (out, in) weight layout
        "w1": jax.random.uniform(k1, (dimX, dimH), jnp.float32, -s1, s1),
        "b1": jax.random.uniform(k2, (1, dimH), jnp.float32, -s1, s1),
        "w2": jax.random.uniform(k3, (dimH, dimC), jnp.float32, -s2, s2),
        "b2": jax.random.uniform(k4, (1, dimC), jnp.float32, -s2, s2),
    }


if __name__ == "__main__":
    # small shapes consistent with the module: x: (B, dimX), y: (B,) integer labels
    B, dimX, dimH, dimC = 8, 32, 64, 4

    key = jax.random.PRNGKey(0)
    kx, ky, kp = jax.random.split(key, 3)

    x = jax.random.normal(kx, (B, dimX), jnp.float32)
    y = jax.random.randint(ky, (B,), 0, dimC, jnp.int32)
    params = init_params(kp, dimX, dimH, dimC)

    # forward (no loss)
    logits = discriminator_apply(params, x, y, compute_loss=False)
    logits = jax.block_until_ready(logits)

    # fused forward + cross-entropy loss (single pallas_call)
    logits2, dloss = discriminator_apply(params, x, y, compute_loss=True)
    dloss = jax.block_until_ready(dloss)

    # sanity check against a pure-JAX reference
    h_ref = jnp.maximum(x @ params["w1"] + params["b1"], 0.0)
    logits_ref = h_ref @ params["w2"] + params["b2"]
    lse = jax.nn.logsumexp(logits_ref, axis=-1)
    loss_ref = jnp.mean(lse - logits_ref[jnp.arange(B), y])

    assert logits.shape == (B, dimC)
    assert jnp.allclose(logits, logits_ref, atol=1e-5, rtol=1e-5)
    assert jnp.allclose(logits2, logits_ref, atol=1e-5, rtol=1e-5)
    assert jnp.allclose(dloss, loss_ref, atol=1e-5, rtol=1e-5)

    print("KERNEL_OK")
</pallas_src>

<mosaic_0001>
module attributes {stable_mosaic.version = 11 : i64} {
  func.func @_mlp_fwd_kernel(%arg0: i32, %arg1: memref<8x32xf32, #tpu.memory_space<vmem>>, %arg2: memref<32x64xf32, #tpu.memory_space<vmem>>, %arg3: memref<1x64xf32, #tpu.memory_space<vmem>>, %arg4: memref<64x128xf32, #tpu.memory_space<vmem>>, %arg5: memref<1x128xf32, #tpu.memory_space<vmem>>, %arg6: memref<8x128xf32, #tpu.memory_space<vmem>>) attributes {dimension_semantics = [#tpu.dimension_semantics<parallel>], iteration_bounds = array<i64: 1>, scalar_prefetch = 0 : i64, scratch_operands = 0 : i64, tpu.core_type = #tpu.core_type<tc>, window_params = [{transform_indices = @transform_0, window_bounds = array<i64: 8, 32>}, {pipeline_mode = #tpu.pipeline_mode<synchronous>, transform_indices = @transform_1, window_bounds = array<i64: 32, 64>}, {pipeline_mode = #tpu.pipeline_mode<synchronous>, transform_indices = @transform_2, window_bounds = array<i64: 1, 64>}, {pipeline_mode = #tpu.pipeline_mode<synchronous>, transform_indices = @transform_3, window_bounds = array<i64: 64, 128>}, {pipeline_mode = #tpu.pipeline_mode<synchronous>, transform_indices = @transform_4, window_bounds = array<i64: 1, 128>}, {transform_indices = @transform_5, window_bounds = array<i64: 8, 128>}]} {
    %c0 = arith.constant 0 : index
    %c0_0 = arith.constant 0 : index
    %0 = vector.load %arg1[%c0, %c0_0] : memref<8x32xf32, #tpu.memory_space<vmem>>, vector<8x32xf32>
    %c0_1 = arith.constant 0 : index
    %c0_2 = arith.constant 0 : index
    %1 = vector.load %arg2[%c0_1, %c0_2] : memref<32x64xf32, #tpu.memory_space<vmem>>, vector<32x64xf32>
    %cst = arith.constant dense<0.000000e+00> : vector<8x64xf32>
    %2 = tpu.matmul %0, %1, %cst {dimension_numbers = #tpu.dot_dimension_numbers<[1], [0], [0], [1], [0, 0, 1, 1], [], []>} : vector<8x32xf32>, vector<32x64xf32>, vector<8x64xf32> -> vector<8x64xf32>
    %c0_3 = arith.constant 0 : index
    %c0_4 = arith.constant 0 : index
    %3 = vector.load %arg3[%c0_3, %c0_4] : memref<1x64xf32, #tpu.memory_space<vmem>>, vector<1x64xf32>
    %4 = vector.broadcast %3 : vector<1x64xf32> to vector<8x64xf32>
    %5 = arith.addf %2, %4 : vector<8x64xf32>
    %cst_5 = arith.constant 0.000000e+00 : f32
    %6 = vector.broadcast %cst_5 : f32 to vector<8x64xf32>
    %7 = arith.maximumf %5, %6 : vector<8x64xf32>
    %c0_6 = arith.constant 0 : index
    %c0_7 = arith.constant 0 : index
    %8 = vector.load %arg4[%c0_6, %c0_7] : memref<64x128xf32, #tpu.memory_space<vmem>>, vector<64x128xf32>
    %cst_8 = arith.constant dense<0.000000e+00> : vector<8x128xf32>
    %9 = tpu.matmul %7, %8, %cst_8 {dimension_numbers = #tpu.dot_dimension_numbers<[1], [0], [0], [1], [0, 0, 1, 1], [], []>} : vector<8x64xf32>, vector<64x128xf32>, vector<8x128xf32> -> vector<8x128xf32>
    %c0_9 = arith.constant 0 : index
    %c0_10 = arith.constant 0 : index
    %10 = vector.load %arg5[%c0_9, %c0_10] : memref<1x128xf32, #tpu.memory_space<vmem>>, vector<1x128xf32>
    %11 = vector.broadcast %10 : vector<1x128xf32> to vector<8x128xf32>
    %12 = arith.addf %9, %11 : vector<8x128xf32>
    %c0_11 = arith.constant 0 : index
    %c0_12 = arith.constant 0 : index
    %13 = vector.load %arg6[%c0_11, %c0_12] : memref<8x128xf32, #tpu.memory_space<vmem>>, vector<8x128xf32>
    tpu.vector_store %arg6[%c0_11, %c0_12], %12 {strides = array<i32>} : memref<8x128xf32, #tpu.memory_space<vmem>>, vector<8x128xf32>,
    return
  }
  func.func @transform_0(%arg0: i32) -> (i32, i32) {
    %c0_i32 = arith.constant 0 : i32
    %c0_i32_0 = arith.constant 0 : i32
    return %arg0, %c0_i32 : i32, i32
  }
  func.func @transform_1(%arg0: i32) -> (i32, i32) {
    %c0_i32 = arith.constant 0 : i32
    %c0_i32_0 = arith.constant 0 : i32
    %c0_i32_1 = arith.constant 0 : i32
    return %c0_i32, %c0_i32_0 : i32, i32
  }
  func.func @transform_2(%arg0: i32) -> (i32, i32) {
    %c0_i32 = arith.constant 0 : i32
    %c0_i32_0 = arith.constant 0 : i32
    %c0_i32_1 = arith.constant 0 : i32
    return %c0_i32, %c0_i32_0 : i32, i32
  }
  func.func @transform_3(%arg0: i32) -> (i32, i32) {
    %c0_i32 = arith.constant 0 : i32
    %c0_i32_0 = arith.constant 0 : i32
    %c0_i32_1 = arith.constant 0 : i32
    return %c0_i32, %c0_i32_0 : i32, i32
  }
  func.func @transform_4(%arg0: i32) -> (i32, i32) {
    %c0_i32 = arith.constant 0 : i32
    %c0_i32_0 = arith.constant 0 : i32
    %c0_i32_1 = arith.constant 0 : i32
    return %c0_i32, %c0_i32_0 : i32, i32
  }
  func.func @transform_5(%arg0: i32) -> (i32, i32) {
    %c0_i32 = arith.constant 0 : i32
    %c0_i32_0 = arith.constant 0 : i32
    return %arg0, %c0_i32 : i32, i32
  }
}

</mosaic_0001>

<bundles_post_ra>
// kernel: tpu_custom_call.1
= control target key start
LH: loop header
LB: loop body
LE: loop exit
PB: predicated region body
PF: predicated region fallthrough
CT: control target
= control target key end

     0   :  { %10 = vsyncpa [#allocation3], 0  ;;  %s451_s0 = inlined_call_operand.hbm [shape: f32[8,32], index: 0, kind: input, shape index: {}]   ;;  %s452_s1 = inlined_call_operand.hbm [shape: f32[32,64], index: 1, kind: input, shape index: {}]   ;;  %s453_s2 = inlined_call_operand.vmem [shape: f32[1,64], index: 2, kind: input, shape index: {}]   ;;  %s454_s3 = inlined_call_operand.hbm [shape: f32[64,128], index: 3, kind: input, shape index: {}]   ;;  %s455_s4 = inlined_call_operand.vmem [shape: f32[1,128], index: 4, kind: input, shape index: {}]   ;;  %s456_s5 = inlined_call_operand.hbm [shape: f32[8,128], index: 5, kind: output, shape index: {}]  }
   0x1   :  { %11 = vsyncpa [#allocation6], 0 }
   0x2   :  { %12 = vsyncpa [#allocation4], 0  ;;  %s395_s18 = smov [#allocation5]  }
   0x3   :  { %s28_s19 = sshll.u32 %s395_s18, 4  ;;  %s29_s19 = int_to_ptr.vmem [resolvable:$true] %s28_s19 }
   0x4   :  { %s317_s20 = scalar_lea.vmem %s29_s19, 512  ;;  %p322_p1 = scmp.lt.s32.totalorder %s29_s19, %s29_s19 }
   0x5   :  { %p318_p0 = scmp.ne.s32.totalorder %s29_s19, %s317_s20  ;;  %p323_p2 = scmp.lt.s32.totalorder %s317_s20, %s317_s20 }
   0x7   :  { %p324_p3 = por %p323_p2, %p322_p1 }
   0x9   :  { %p325_p4 = pnand %p324_p3, %p318_p0 }
   0xb   :  { %328 = shalt.err (!%p325_p4)
}
   0xc   :  { %s396_s21 = smov 128   ;;  %s397_s22 = smov 8  }
   0xd   :  { %34 = dma.hbm_to_vmem [thread:$0]  %s452_s1, 512, %s29_s19, [#allocation6], %s396_s21, %s396_s21, %s397_s22  }
   0xe   :  { %s398_s25 = smov [#allocation2]   ;;  %s399_s27 = smov [#allocation7]  }
   0xf   :  { %s19_s26 = sshll.u32 %s398_s25, 4  ;;  %s42_s28 = sshll.u32 %s399_s27, 4  ;;  %s20_s26 = int_to_ptr.vmem [resolvable:$true] %s19_s26  ;;  %s43_s28 = int_to_ptr.vmem [resolvable:$true] %s42_s28 }
  0x10   :  { %s337_s29 = scalar_lea.vmem %s20_s26, 128  ;;  %p342_p6 = scmp.lt.s32.totalorder %s20_s26, %s20_s26 }
  0x11   :  { %p338_p5 = scmp.ne.s32.totalorder %s20_s26, %s337_s29  ;;  %p343_p7 = scmp.lt.s32.totalorder %s337_s29, %s337_s29 }
  0x13   :  { %p344_p8 = por %p343_p7, %p342_p6 }
  0x15   :  { %p345_p9 = pnand %p344_p8, %p338_p5 }
  0x17   :  { %348 = shalt.err (!%p345_p9)
}
  0x18   :  { %22 = dma.hbm_to_vmem [thread:$0]  %s451_s0, 128, %s20_s26, [#allocation3]  }
  0x19   :  { %s357_s7 = scalar_lea.vmem %s43_s28, 1024  ;;  %p362_p11 = scmp.lt.s32.totalorder %s43_s28, %s43_s28 }
  0x1a   :  { %p358_p10 = scmp.ne.s32.totalorder %s43_s28, %s357_s7  ;;  %p363_p12 = scmp.lt.s32.totalorder %s357_s7, %s357_s7 }
  0x1c   :  { %p364_p13 = por %p363_p12, %p362_p11 }
  0x1e   :  { %p365_p0 = pnand %p364_p13, %p358_p10 }
  0x20   :  { %368 = shalt.err (!%p365_p0)
}
  0x21   :  { %48 = dma.hbm_to_vmem [thread:$0]  %s454_s3, 1024, %s43_s28, [#allocation6], %s396_s21, %s396_s21, %s397_s22  }
  0x22   :  { %389 = dma.done.wait [#allocation3], 128  }
  0x23   :  { %390 = vsyncadd [#allocation3], 4294967168 }
  0x24   :  { %391 = dma.done.wait [#allocation6], 1536  }
  0x25   :  { %392 = vsyncadd [#allocation6], 4294965760  ;;  %v400_v0 = vmov 0.0   ;;  %vm401_vm0 = vmmov 0   ;;  %v64_v1 = vld [vmem:[#allocation5 + $0x18] sm:$0xff]  ;;  %v63_v2 = vld [vmem:[#allocation5 + $0x10] sm:$0xff] }
  0x26   :  { %271 = vmatprep.subr.mxu0 %v400_v0  ;;  %279 = vmatprep.mubr.msk.f32.mxu0 %vm401_vm0, %v400_v0  ;;  %v154_v3 = vld [vmem:[#allocation7 + $0x38] sm:$0xff]  ;;  %v62_v4 = vld [vmem:[#allocation5 + $0x8] sm:$0xff]  ;;  %v153_v5 = vld [vmem:[#allocation7 + $0x30] sm:$0xff]  ;;  %vm72_vm1 = vcmask 261120   ;;  %vm162_vm2 = vcmask 523264   ;;  %s402_s11 = smov [#allocation8]  }
  0x27   :  { %282 = vmatprep.subr.mxu1 %v400_v0  ;;  %298 = vmatprep.mubr.msk.f32.mxu1 %vm401_vm0, %v400_v0  ;;  %v152_v6 = vld [vmem:[#allocation7 + $0x28] sm:$0xff]  ;;  %v61_v7 = vld [vmem:[#allocation5] sm:$0xff]  ;;  %v60_v8 = vld [vmem:[#allocation2] sm:$0xff]  ;;  %s243_s12 = sshll.u32 %s402_s11, 4  ;;  %s244_s12 = int_to_ptr.vmem [resolvable:$true] %s243_s12 }
  0x28   :  { %272 = vmatpush3.msra.mxu0 %v64_v1  ;;  %283 = vmatpush3.msra.mxu1 %v154_v3  ;;  %v151_v9 = vld [vmem:[#allocation7 + $0x20] sm:$0xff]  ;;  %v150_v10 = vld [vmem:[#allocation7 + $0x18] sm:$0xff]  ;;  %v149_v11 = vld [vmem:[#allocation7 + $0x10] sm:$0xff]  ;;  %s369_s13 = scalar_lea.vmem %s244_s12, 128  ;;  %p374_p2 = scmp.lt.s32.totalorder %s244_s12, %s244_s12 }
  0x29   :  { %273 = vmatprep.subr.mxu0 %v400_v0  ;;  %284 = vmatprep.subr.mxu1 %v400_v0  ;;  %v148_v12 = vld [vmem:[#allocation7 + $0x8] sm:$0xff]  ;;  %v147_v13 = vld [vmem:[#allocation7] sm:$0xff]  ;;  %v253_v14 = vld [vmem:[%s453_s2] ss:$0 sm:$0xff]  ;;  %p370_p1 = scmp.ne.s32.totalorder %s244_s12, %s369_s13  ;;  %p375_p3 = scmp.lt.s32.totalorder %s369_s13, %s369_s13 }
  0x2a   :  { %274 = vmatpush3.msra.mxu0 %v63_v2  ;;  %285 = vmatpush3.msra.mxu1 %v153_v5  ;;  %v255_v19 = vld [vmem:[%s455_s4] ss:$0 sm:$0xff] }
  0x2b   :  { %275 = vmatprep.subr.mxu0 %v400_v0  ;;  %286 = vmatprep.subr.mxu1 %v400_v0  ;;  %p376_p4 = por %p375_p3, %p374_p2 }
  0x2c   :  { %276 = vmatpush3.msra.mxu0 %v62_v4  ;;  %287 = vmatpush3.msra.mxu1 %v152_v6 }
  0x2d   :  { %277 = vmatprep.subr.mxu0 %v400_v0  ;;  %288 = vmatprep.subr.mxu1 %v400_v0  ;;  %p377_p5 = pnand %p376_p4, %p370_p1 }
  0x2e   :  { %278 = vmatpush3.msra.mxu0 %v61_v7  ;;  %289 = vmatpush3.msra.mxu1 %v151_v9 }
  0x2f   :  { %280 = vmatmul.mubr.msk.f32.vlgmr.msra.gmra.mxu0 %vm72_vm1, %v60_v8  ;;  %290 = vmatprep.subr.mxu1 %v400_v0 }
  0x30   :  { %291 = vmatpush3.msra.mxu1 %v150_v10 }
  0x31   :  { %292 = vmatprep.subr.mxu1 %v400_v0 }
  0x32   :  { %293 = vmatpush3.msra.mxu1 %v149_v11 }
  0x33   :  { %294 = vmatprep.subr.mxu1 %v400_v0 }
  0x34   :  { %295 = vmatpush3.msra.mxu1 %v148_v12 }
  0x35   :  { %296 = vmatprep.subr.mxu1 %v400_v0 }
  0x36   :  { %297 = vmatpush3.msra.mxu1 %v147_v13 }
  0xef   :  { %v142_v15 = vpop.f32.mrf.mxu0 }
  0xf0   :  { %v143_v16 = vadd.f32 %v253_v14, %v142_v15 }
  0xf1   :  { %v281_v17 = vpop.f32.mrf.mxu0 }
  0xf2   :  { %v146_v18 = vmax.f32 %v143_v16, 0.0 }
  0xf4   :  { %299 = vmatmul.mubr.msk.f32.vlgmr.msra.gmra.mxu1 %vm162_vm2, %v146_v18 }
 0x1b4   :  { %v232_v20 = vpop.f32.mrf.mxu1 }
 0x1b5   :  { %v233_v21 = vadd.f32 %v255_v19, %v232_v20 }
 0x1b6   :  { %v300_v22 = vpop.f32.mrf.mxu1 }
 0x1b7   :  { %236 = vst [vmem:[#allocation8] sm:$0xff] %v233_v21 }
 0x1b8   :  { %380 = shalt.err (!%p377_p5)
}
 0x1b9   :  { %246 = dma.vmem_to_hbm [thread:$0]  %s244_s12, 128, %s456_s5, [#allocation4]  }
 0x1ba   :  { %393 = dma.done.wait [#allocation4], 128  }
 0x1bb   :  { %394 = vsyncadd [#allocation4], 4294967168 }
 0x1bc   :  { %250 = vsyncpa [#allocation3], 1 }
 0x1bd   :  { %251 = vsyncpa [#allocation6], 1 }
 0x1be   :  { %252 = vsyncpa [#allocation4], 1 }

</bundles_post_ra>
